<compile_context>
chip_gen: v6e
topology: v6e:2x2x1
jax: 0.10.0
libtpu: 0.0.40
codegen_flags: <defaults>
</compile_context>

<pallas_src>
import functools

import jax
import jax.numpy as jnp
from jax import lax
from jax.experimental import pallas as pl
from jax.experimental.pallas import tpu as pltpu

EPS = 1e-5
_MAX_TM_BLOCKS = 32          # up to 32*128 = 4096 output lanes per grid step


def _cdiv(a, b):
    return -(-a // b)


@functools.lru_cache(maxsize=None)
def _vmem_limit_bytes():
    """Scoped-VMEM cap from the local chip's physical capacity (128 MiB on
    v5e/v6e, 64 MiB on v7x); use ~3/4 of physical, never below 32 MiB."""
    try:
        cap = int(pltpu.get_tpu_info().vmem_capacity_bytes)
    except Exception:
        cap = 64 * 1024 * 1024
    return max(32 * 1024 * 1024, (cap * 3) // 4)


@functools.lru_cache(maxsize=None)
def _num_tensorcores():
    """TensorCores per chip (2 on v7x megacore, 1 on v5e/v6e).  Defaults to 1
    so single-core chips never pay the tile-split overhead."""
    try:
        dev = jax.devices()[0]
        for attr in ("num_cores", "core_count"):
            v = getattr(dev, attr, None)
            if isinstance(v, int) and v > 0:
                return v
    except Exception:
        pass
    return 1


# ----------------------------------------------------------------------------
# Pallas kernel: fused  W_eff @ cols + shift (+ residual) (+ ReLU)
#   W_eff : (Nout, K)   bf16   (BN scale folded in, grid-invariant)
#   cols  : (K, tm)     bf16   (lane dim = flattened spatial positions)
#   shift : (Nout, 1)   f32
#   res   : (Nout, tm)  bf16   (optional)
#   out   : (Nout, tm)  bf16 (intermediate layers) / f32 -- lane-dense stores
# ----------------------------------------------------------------------------
def _fused_kernel(relu, has_res):
    def kernel(*refs):
        if has_res:
            w_ref, c_ref, shift_ref, res_ref, o_ref = refs
        else:
            w_ref, c_ref, shift_ref, o_ref = refs
        y = jnp.dot(w_ref[...], c_ref[...], preferred_element_type=jnp.float32)
        y = y + shift_ref[...]                     # (Nout,1) broadcasts over lanes
        if has_res:
            y = y + res_ref[...].astype(jnp.float32)
        if relu:
            y = jnp.maximum(y, 0.0)
        o_ref[...] = y.astype(o_ref.dtype)

    return kernel


def _choose_tile_m(m, n_out, k, has_res, out_itemsize):
    """Lane-tile size (multiple of 128), grid steps, padded M.

    Largest tile whose double-buffered working set fits the VMEM budget; split
    only on multi-TensorCore chips and only when >=2 steps per core remain."""
    blocks = _cdiv(m, 128)
    budget = _vmem_limit_bytes()

    def working_set(tmb):
        tm = tmb * 128
        fixed = n_out * k * 2 + n_out * 4                    # bf16 weights + f32 shift
        per_step = k * tm * 2 + n_out * tm * out_itemsize    # cols tile + out tile
        if has_res:
            per_step += n_out * tm * 2
        return 2 * (fixed + per_step)                        # double buffering

    tmb = max(1, min(_MAX_TM_BLOCKS, blocks))
    while tmb > 1 and working_set(tmb) > budget:
        tmb -= 1
    assert working_set(tmb) <= budget, "tile working set exceeds VMEM budget"

    ncores = _num_tensorcores()
    if ncores > 1 and blocks >= 2 * ncores:
        # v7x megacore: keep >=2 grid steps per TensorCore so the cols DMA can
        # still overlap compute on each core.  Never split on v5e/v6e (1 TC).
        tmb = min(tmb, _cdiv(blocks, 2 * ncores))

    tm = tmb * 128
    grid = _cdiv(blocks, tmb)
    return tm, grid, grid * tm


def fused_matmul_bn(w_eff, cols, shift, residual=None, relu=True,
                    out_dtype=jnp.bfloat16):
    """w_eff: (Nout,K) bf16; cols: (K,M) bf16; shift: (Nout,);
    residual: (Nout,M)|None.  Returns (Nout, M) in out_dtype."""
    n_out, k = w_eff.shape
    m = cols.shape[1]
    has_res = residual is not None
    out_itemsize = jnp.dtype(out_dtype).itemsize
    tm, grid, mp = _choose_tile_m(m, n_out, k, has_res, out_itemsize)

    if mp != m:                        # zero-pad lanes; padded columns sliced off below
        cols = jnp.pad(cols, ((0, 0), (0, mp - m)))
        if has_res:
            residual = jnp.pad(residual, ((0, 0), (0, mp - m)))

    in_specs = [
        pl.BlockSpec((n_out, k), lambda i: (0, 0)),      # weights (grid-invariant)
        pl.BlockSpec((k, tm), lambda i: (0, i)),         # cols tile (K unpadded, full extent)
        pl.BlockSpec((n_out, 1), lambda i: (0, 0)),      # folded-BN shift
    ]
    args = [w_eff, cols, shift.reshape(n_out, 1).astype(jnp.float32)]
    if has_res:
        in_specs.append(pl.BlockSpec((n_out, tm), lambda i: (0, i)))
        args.append(residual.astype(jnp.bfloat16))

    out = pl.pallas_call(
        _fused_kernel(relu, has_res),
        out_shape=jax.ShapeDtypeStruct((n_out, mp), out_dtype),
        grid_spec=pltpu.PrefetchScalarGridSpec(
            num_scalar_prefetch=0,
            grid=(grid,),
            in_specs=in_specs,
            out_specs=pl.BlockSpec((n_out, tm), lambda i: (0, i)),
        ),
        compiler_params=pltpu.CompilerParams(
            dimension_semantics=("parallel",),
            vmem_limit_bytes=_vmem_limit_bytes(),
        ),
    )(*args)
    return out[:, :m] if mp != m else out


# ----------------------------------------------------------------------------
# JAX glue: patch extraction in the (C, N, D, H, W) layout (cols come out
# directly as (K, M) -- no big-array transposes), bf16 throughout.
# ----------------------------------------------------------------------------
def _im2col_3x3(x, stride):
    """x: (C, N, D, H, W) bf16 -> cols (C*27, N*Do*Ho*Wo) bf16, output spatial."""
    c, n, d, h, w = x.shape
    do = (d - 1) // stride + 1
    ho = (h - 1) // stride + 1
    wo = (w - 1) // stride + 1
    xp = jnp.pad(x.astype(jnp.bfloat16),
                 ((0, 0), (0, 0), (1, 1), (1, 1), (1, 1)))
    taps = []
    for kd in range(3):
        for kh in range(3):
            for kw in range(3):
                taps.append(xp[:, :,
                               kd:kd + stride * (do - 1) + 1:stride,
                               kh:kh + stride * (ho - 1) + 1:stride,
                               kw:kw + stride * (wo - 1) + 1:stride])
    cols = jnp.stack(taps, axis=1)                 # (C, 27, N, Do, Ho, Wo)
    return cols.reshape(c * 27, n * do * ho * wo), (n, do, ho, wo)


def conv3d_bn(x, p, stride, relu, residual=None, out_dtype=jnp.bfloat16):
    """Conv3d(k=3, pad=1) + folded BN (+res) (+ReLU).  x: (Cin, N, D, H, W) bf16."""
    cols, (n, do, ho, wo) = _im2col_3x3(x, stride)
    res = None
    if residual is not None:
        res = residual.astype(jnp.bfloat16).reshape(residual.shape[0], -1)
    y = fused_matmul_bn(p["w_eff"], cols, p["shift_k"], res, relu, out_dtype)
    return y.reshape(p["w_eff"].shape[0], n, do, ho, wo)


def deconv3d_bn(x, p, relu, residual=None, out_dtype=jnp.bfloat16):
    """ConvTranspose3d(k=3, s=2, p=1, op=1) + folded BN (+res) (+ReLU), polyphase.

    x: (Cin, N, D, H, W) bf16  ->  (Cout, N, 2D, 2H, 2W).
    All 8 output parity classes are GEMM'd together from 2x2x2 input patches
    using the combined (8*Cout, 8*Cin) weight built at init -- no zero-dilated
    intermediate array.
    """
    c, n, d, h, w = x.shape
    xp = jnp.pad(x.astype(jnp.bfloat16),
                 ((0, 0), (0, 0), (0, 1), (0, 1), (0, 1)))
    taps = []
    for td in range(2):
        for th in range(2):
            for tw in range(2):
                taps.append(xp[:, :, td:td + d, th:th + h, tw:tw + w])
    cols = jnp.stack(taps, axis=1).reshape(c * 8, n * d * h * w)

    n_out8 = p["w_eff"].shape[0]
    cout = n_out8 // 8
    res = None
    if residual is not None:
        # Residual is at output resolution: cast to bf16 BEFORE the parity-major
        # shuffle (halves the HBM traffic of the interleave).
        r = residual.astype(jnp.bfloat16).reshape(cout, n, d, 2, h, 2, w, 2)
        res = jnp.transpose(r, (3, 5, 7, 0, 1, 2, 4, 6)).reshape(n_out8, n * d * h * w)

    y = fused_matmul_bn(p["w_eff"], cols, p["shift_k"], res, relu, out_dtype)
    y = y.reshape(2, 2, 2, cout, n, d, h, w)       # parity -> spatial, in bf16
    y = jnp.transpose(y, (3, 4, 5, 0, 6, 1, 7, 2))
    return y.reshape(cout, n, 2 * d, 2 * h, 2 * w)


# ----------------------------------------------------------------------------
# Parameters (deterministic init) with folded eval-mode BatchNorm
# ----------------------------------------------------------------------------
def _fold_deconv_weight(w):
    """(Cin, Cout, 3,3,3) ConvTranspose3d weight -> combined polyphase matrix
    (8*Cout, 8*Cin): rows = (pd,ph,pw,cout), cols = (cin,td,th,tw)."""
    cin, cout = w.shape[0], w.shape[1]
    # (output parity, neighbour tap) -> kernel index along that dim; (0,1) has a 0 coeff.
    kmap = {(0, 0): 1, (1, 0): 2, (1, 1): 0}
    wc = jnp.zeros((2, 2, 2, cout, cin, 2, 2, 2), jnp.float32)
    for pd in (0, 1):
        for ph in (0, 1):
            for pw in (0, 1):
                for td in (0, 1):
                    for th in (0, 1):
                        for tw in (0, 1):
                            kd = kmap.get((pd, td))
                            kh = kmap.get((ph, th))
                            kw = kmap.get((pw, tw))
                            if kd is None or kh is None or kw is None:
                                continue
                            wc = wc.at[pd, ph, pw, :, :, td, th, tw].set(
                                w[:, :, kd, kh, kw].T)
    return wc.reshape(8 * cout, cin * 8)


def init_conv_bn(key, cin, cout, transpose=False):
    kw, kg, kb, km, kv = jax.random.split(key, 5)
    if transpose:
        # PyTorch ConvTranspose3d weight: (Cin, Cout, kD, kH, kW)
        w = 0.1 * jax.random.normal(kw, (cin, cout, 3, 3, 3), jnp.float32)
        w_mat = _fold_deconv_weight(w)               # (8*Cout, 8*Cin)
    else:
        # PyTorch Conv3d weight: (Cout, Cin, kD, kH, kW)
        w = 0.1 * jax.random.normal(kw, (cout, cin, 3, 3, 3), jnp.float32)
        w_mat = w.reshape(cout, cin * 27)            # rows = cout, cols = (cin, kd,kh,kw)
    gamma = 1.0 + 0.1 * jax.random.normal(kg, (cout,), jnp.float32)
    beta = 0.1 * jax.random.normal(kb, (cout,), jnp.float32)
    mean = 0.1 * jax.random.normal(km, (cout,), jnp.float32)
    var = 1.0 + 0.1 * jax.random.uniform(kv, (cout,), jnp.float32)
    scale = gamma / jnp.sqrt(var + EPS)
    shift = beta - mean * scale
    scale_k = jnp.tile(scale, 8) if transpose else scale
    shift_k = jnp.tile(shift, 8) if transpose else shift
    w_eff = (w_mat * scale_k[:, None]).astype(jnp.bfloat16)   # fold BN scale into weights
    return {"w": w, "w_eff": w_eff, "shift_k": shift_k,
            "scale": scale, "shift": shift, "transpose": transpose}


# ----------------------------------------------------------------------------
# hourglass.forward
# ----------------------------------------------------------------------------
def hourglass_forward(x_ncdhw, params, presqu=None, postsqu=None):
    # Internal layout (C, N, D, H, W), bf16 end-to-end; f32 only on the outputs.
    to_int = lambda t: None if t is None else jnp.transpose(
        t.astype(jnp.bfloat16), (1, 0, 2, 3, 4))
    to_ext = lambda t: jnp.transpose(t, (1, 0, 2, 3, 4)).astype(jnp.float32)

    x = to_int(x_ncdhw)
    presqu_i = to_int(presqu)
    postsqu_i = to_int(postsqu)

    out = conv3d_bn(x, params["conv1"], stride=2, relu=True)                  # conv1
    pre = conv3d_bn(out, params["conv2"], stride=1, relu=True,
                    residual=postsqu_i)                                       # conv2 (+postsqu) + relu
    out = conv3d_bn(pre, params["conv3"], stride=2, relu=True)                # conv3
    out = conv3d_bn(out, params["conv4"], stride=1, relu=True)                # conv4
    res5 = presqu_i if presqu_i is not None else pre
    post = deconv3d_bn(out, params["conv5"], relu=True, residual=res5)        # conv5 + residual + relu
    out = deconv3d_bn(post, params["conv6"], relu=False)                      # conv6 (no relu)

    return to_ext(out), to_ext(pre), to_ext(post)


# ----------------------------------------------------------------------------
# Pure-JAX reference (lax conv, f32) for verification
# ----------------------------------------------------------------------------
def _ref_conv(x, p, stride):
    w = p["w"]
    if p["transpose"]:
        rhs = jnp.transpose(w[:, :, ::-1, ::-1, ::-1], (2, 3, 4, 0, 1))  # DHWIO
        y = lax.conv_general_dilated(
            x, rhs, window_strides=(1, 1, 1),
            padding=((1, 2), (1, 2), (1, 2)), lhs_dilation=(2, 2, 2),
            dimension_numbers=("NDHWC", "DHWIO", "NDHWC"))
    else:
        rhs = jnp.transpose(w, (2, 3, 4, 1, 0))  # DHWIO
        y = lax.conv_general_dilated(
            x, rhs, window_strides=(stride,) * 3, padding=((1, 1),) * 3,
            dimension_numbers=("NDHWC", "DHWIO", "NDHWC"))
    return y * p["scale"] + p["shift"]


def ref_forward(x_ncdhw, params):
    x = jnp.transpose(x_ncdhw, (0, 2, 3, 4, 1))
    out = jnp.maximum(_ref_conv(x, params["conv1"], 2), 0.0)
    pre = jnp.maximum(_ref_conv(out, params["conv2"], 1), 0.0)
    out = jnp.maximum(_ref_conv(pre, params["conv3"], 2), 0.0)
    out = jnp.maximum(_ref_conv(out, params["conv4"], 1), 0.0)
    post = jnp.maximum(_ref_conv(out, params["conv5"], 1) + pre, 0.0)
    out = _ref_conv(post, params["conv6"], 1)
    t = lambda a: jnp.transpose(a, (0, 4, 1, 2, 3))
    return t(out), t(pre), t(post)


# ----------------------------------------------------------------------------
if __name__ == "__main__":
    inplanes = 4
    Nb, D, H, W = 1, 8, 16, 16

    key = jax.random.PRNGKey(0)
    kx, k1, k2, k3, k4, k5, k6 = jax.random.split(key, 7)
    x = jax.random.normal(kx, (Nb, inplanes, D, H, W), jnp.float32)

    params = {
        "conv1": init_conv_bn(k1, inplanes, 2 * inplanes),
        "conv2": init_conv_bn(k2, 2 * inplanes, 2 * inplanes),
        "conv3": init_conv_bn(k3, 2 * inplanes, 2 * inplanes),
        "conv4": init_conv_bn(k4, 2 * inplanes, 2 * inplanes),
        "conv5": init_conv_bn(k5, 2 * inplanes, 2 * inplanes, transpose=True),
        "conv6": init_conv_bn(k6, 2 * inplanes, inplanes, transpose=True),
    }

    fwd = jax.jit(functools.partial(hourglass_forward, params=params,
                                    presqu=None, postsqu=None))
    out, pre, post = fwd(x)
    jax.block_until_ready((out, pre, post))

    assert out.shape == (Nb, inplanes, D, H, W)
    assert pre.shape == (Nb, 2 * inplanes, D // 2, H // 2, W // 2)
    assert post.shape == (Nb, 2 * inplanes, D // 2, H // 2, W // 2)

    ro, rp, rq = ref_forward(x, params)

    def relerr(a, b):
        return float(jnp.max(jnp.abs(a - b)) / (jnp.max(jnp.abs(b)) + 1e-6))

    # bf16 weights/patches AND bf16 intermediate activations across 6 chained
    # layers vs. an all-f32 reference -> loose tolerance; still catches any
    # structural/indexing error (which would give O(1) relative error).
    assert relerr(out, ro) < 1e-1, relerr(out, ro)
    assert relerr(pre, rp) < 1e-1, relerr(pre, rp)
    assert relerr(post, rq) < 1e-1, relerr(post, rq)

    print("KERNEL_OK")
</pallas_src>

<mosaic_0001>
module attributes {stable_mosaic.version = 11 : i64} {
  func.func @kernel(%arg0: i32, %arg1: memref<8x108xbf16, #tpu.memory_space<vmem>>, %arg2: memref<108x256xbf16, #tpu.memory_space<vmem>>, %arg3: memref<8x1xf32, #tpu.memory_space<vmem>>, %arg4: memref<8x256xbf16, #tpu.memory_space<vmem>>) attributes {dimension_semantics = [#tpu.dimension_semantics<parallel>], iteration_bounds = array<i64: 1>, scalar_prefetch = 0 : i64, scratch_operands = 0 : i64, tpu.core_type = #tpu.core_type<tc>, window_params = [{pipeline_mode = #tpu.pipeline_mode<synchronous>, transform_indices = @transform_0, window_bounds = array<i64: 8, 108>}, {transform_indices = @transform_1, window_bounds = array<i64: 108, 256>}, {pipeline_mode = #tpu.pipeline_mode<synchronous>, transform_indices = @transform_2, window_bounds = array<i64: 8, 1>}, {transform_indices = @transform_3, window_bounds = array<i64: 8, 256>}]} {
    %c0 = arith.constant 0 : index
    %c0_0 = arith.constant 0 : index
    %0 = vector.load %arg1[%c0, %c0_0] : memref<8x108xbf16, #tpu.memory_space<vmem>>, vector<8x108xbf16>
    %c0_1 = arith.constant 0 : index
    %c0_2 = arith.constant 0 : index
    %1 = vector.load %arg2[%c0_1, %c0_2] : memref<108x256xbf16, #tpu.memory_space<vmem>>, vector<108x256xbf16>
    %cst = arith.constant dense<0.000000e+00> : vector<8x256xf32>
    %2 = tpu.matmul %0, %1, %cst {dimension_numbers = #tpu.dot_dimension_numbers<[1], [0], [0], [1], [0, 0, 1, 1], [], []>} : vector<8x108xbf16>, vector<108x256xbf16>, vector<8x256xf32> -> vector<8x256xf32>
    %c0_3 = arith.constant 0 : index
    %c0_4 = arith.constant 0 : index
    %3 = vector.load %arg3[%c0_3, %c0_4] : memref<8x1xf32, #tpu.memory_space<vmem>>, vector<8x1xf32>
    %4 = vector.broadcast %3 : vector<8x1xf32> to vector<8x256xf32>
    %5 = arith.addf %2, %4 : vector<8x256xf32>
    %cst_5 = arith.constant 0.000000e+00 : f32
    %6 = vector.broadcast %cst_5 : f32 to vector<8x256xf32>
    %7 = arith.maximumf %5, %6 : vector<8x256xf32>
    %8 = arith.truncf %7 : vector<8x256xf32> to vector<8x256xbf16>
    %c0_6 = arith.constant 0 : index
    %c0_7 = arith.constant 0 : index
    %9 = vector.load %arg4[%c0_6, %c0_7] : memref<8x256xbf16, #tpu.memory_space<vmem>>, vector<8x256xbf16>
    tpu.vector_store %arg4[%c0_6, %c0_7], %8 {strides = array<i32>} : memref<8x256xbf16, #tpu.memory_space<vmem>>, vector<8x256xbf16>,
    return
  }
  func.func @transform_0(%arg0: i32) -> (i32, i32) {
    %c0_i32 = arith.constant 0 : i32
    %c0_i32_0 = arith.constant 0 : i32
    %c0_i32_1 = arith.constant 0 : i32
    return %c0_i32, %c0_i32_0 : i32, i32
  }
  func.func @transform_1(%arg0: i32) -> (i32, i32) {
    %c0_i32 = arith.constant 0 : i32
    %c0_i32_0 = arith.constant 0 : i32
    return %c0_i32, %arg0 : i32, i32
  }
  func.func @transform_2(%arg0: i32) -> (i32, i32) {
    %c0_i32 = arith.constant 0 : i32
    %c0_i32_0 = arith.constant 0 : i32
    %c0_i32_1 = arith.constant 0 : i32
    return %c0_i32, %c0_i32_0 : i32, i32
  }
  func.func @transform_3(%arg0: i32) -> (i32, i32) {
    %c0_i32 = arith.constant 0 : i32
    %c0_i32_0 = arith.constant 0 : i32
    return %c0_i32, %arg0 : i32, i32
  }
}

module attributes {stable_mosaic.version = 11 : i64} {
  func.func @kernel(%arg0: i32, %arg1: memref<8x216xbf16, #tpu.memory_space<vmem>>, %arg2: memref<216x256xbf16, #tpu.memory_space<vmem>>, %arg3: memref<8x1xf32, #tpu.memory_space<vmem>>, %arg4: memref<8x256xbf16, #tpu.memory_space<vmem>>) attributes {dimension_semantics = [#tpu.dimension_semantics<parallel>], iteration_bounds = array<i64: 1>, scalar_prefetch = 0 : i64, scratch_operands = 0 : i64, tpu.core_type = #tpu.core_type<tc>, window_params = [{pipeline_mode = #tpu.pipeline_mode<synchronous>, transform_indices = @transform_0, window_bounds = array<i64: 8, 216>}, {transform_indices = @transform_1, window_bounds = array<i64: 216, 256>}, {pipeline_mode = #tpu.pipeline_mode<synchronous>, transform_indices = @transform_2, window_bounds = array<i64: 8, 1>}, {transform_indices = @transform_3, window_bounds = array<i64: 8, 256>}]} {
    %c0 = arith.constant 0 : index
    %c0_0 = arith.constant 0 : index
    %0 = vector.load %arg1[%c0, %c0_0] : memref<8x216xbf16, #tpu.memory_space<vmem>>, vector<8x216xbf16>
    %c0_1 = arith.constant 0 : index
    %c0_2 = arith.constant 0 : index
    %1 = vector.load %arg2[%c0_1, %c0_2] : memref<216x256xbf16, #tpu.memory_space<vmem>>, vector<216x256xbf16>
    %cst = arith.constant dense<0.000000e+00> : vector<8x256xf32>
    %2 = tpu.matmul %0, %1, %cst {dimension_numbers = #tpu.dot_dimension_numbers<[1], [0], [0], [1], [0, 0, 1, 1], [], []>} : vector<8x216xbf16>, vector<216x256xbf16>, vector<8x256xf32> -> vector<8x256xf32>
    %c0_3 = arith.constant 0 : index
    %c0_4 = arith.constant 0 : index
    %3 = vector.load %arg3[%c0_3, %c0_4] : memref<8x1xf32, #tpu.memory_space<vmem>>, vector<8x1xf32>
    %4 = vector.broadcast %3 : vector<8x1xf32> to vector<8x256xf32>
    %5 = arith.addf %2, %4 : vector<8x256xf32>
    %cst_5 = arith.constant 0.000000e+00 : f32
    %6 = vector.broadcast %cst_5 : f32 to vector<8x256xf32>
    %7 = arith.maximumf %5, %6 : vector<8x256xf32>
    %8 = arith.truncf %7 : vector<8x256xf32> to vector<8x256xbf16>
    %c0_6 = arith.constant 0 : index
    %c0_7 = arith.constant 0 : index
    %9 = vector.load %arg4[%c0_6, %c0_7] : memref<8x256xbf16, #tpu.memory_space<vmem>>, vector<8x256xbf16>
    tpu.vector_store %arg4[%c0_6, %c0_7], %8 {strides = array<i32>} : memref<8x256xbf16, #tpu.memory_space<vmem>>, vector<8x256xbf16>,
    return
  }
  func.func @transform_0(%arg0: i32) -> (i32, i32) {
    %c0_i32 = arith.constant 0 : i32
    %c0_i32_0 = arith.constant 0 : i32
    %c0_i32_1 = arith.constant 0 : i32
    return %c0_i32, %c0_i32_0 : i32, i32
  }
  func.func @transform_1(%arg0: i32) -> (i32, i32) {
    %c0_i32 = arith.constant 0 : i32
    %c0_i32_0 = arith.constant 0 : i32
    return %c0_i32, %arg0 : i32, i32
  }
  func.func @transform_2(%arg0: i32) -> (i32, i32) {
    %c0_i32 = arith.constant 0 : i32
    %c0_i32_0 = arith.constant 0 : i32
    %c0_i32_1 = arith.constant 0 : i32
    return %c0_i32, %c0_i32_0 : i32, i32
  }
  func.func @transform_3(%arg0: i32) -> (i32, i32) {
    %c0_i32 = arith.constant 0 : i32
    %c0_i32_0 = arith.constant 0 : i32
    return %c0_i32, %arg0 : i32, i32
  }
}

module attributes {stable_mosaic.version = 11 : i64} {
  func.func @kernel(%arg0: i32, %arg1: memref<8x216xbf16, #tpu.memory_space<vmem>>, %arg2: memref<216x128xbf16, #tpu.memory_space<vmem>>, %arg3: memref<8x1xf32, #tpu.memory_space<vmem>>, %arg4: memref<8x128xbf16, #tpu.memory_space<vmem>>) attributes {dimension_semantics = [#tpu.dimension_semantics<parallel>], iteration_bounds = array<i64: 1>, scalar_prefetch = 0 : i64, scratch_operands = 0 : i64, tpu.core_type = #tpu.core_type<tc>, window_params = [{pipeline_mode = #tpu.pipeline_mode<synchronous>, transform_indices = @transform_0, window_bounds = array<i64: 8, 216>}, {transform_indices = @transform_1, window_bounds = array<i64: 216, 128>}, {pipeline_mode = #tpu.pipeline_mode<synchronous>, transform_indices = @transform_2, window_bounds = array<i64: 8, 1>}, {transform_indices = @transform_3, window_bounds = array<i64: 8, 128>}]} {
    %c0 = arith.constant 0 : index
    %c0_0 = arith.constant 0 : index
    %0 = vector.load %arg1[%c0, %c0_0] : memref<8x216xbf16, #tpu.memory_space<vmem>>, vector<8x216xbf16>
    %c0_1 = arith.constant 0 : index
    %c0_2 = arith.constant 0 : index
    %1 = vector.load %arg2[%c0_1, %c0_2] : memref<216x128xbf16, #tpu.memory_space<vmem>>, vector<216x128xbf16>
    %cst = arith.constant dense<0.000000e+00> : vector<8x128xf32>
    %2 = tpu.matmul %0, %1, %cst {dimension_numbers = #tpu.dot_dimension_numbers<[1], [0], [0], [1], [0, 0, 1, 1], [], []>} : vector<8x216xbf16>, vector<216x128xbf16>, vector<8x128xf32> -> vector<8x128xf32>
    %c0_3 = arith.constant 0 : index
    %c0_4 = arith.constant 0 : index
    %3 = vector.load %arg3[%c0_3, %c0_4] : memref<8x1xf32, #tpu.memory_space<vmem>>, vector<8x1xf32>
    %4 = vector.broadcast %3 : vector<8x1xf32> to vector<8x128xf32>
    %5 = arith.addf %2, %4 : vector<8x128xf32>
    %cst_5 = arith.constant 0.000000e+00 : f32
    %6 = vector.broadcast %cst_5 : f32 to vector<8x128xf32>
    %7 = arith.maximumf %5, %6 : vector<8x128xf32>
    %8 = arith.truncf %7 : vector<8x128xf32> to vector<8x128xbf16>
    %c0_6 = arith.constant 0 : index
    %c0_7 = arith.constant 0 : index
    %9 = vector.load %arg4[%c0_6, %c0_7] : memref<8x128xbf16, #tpu.memory_space<vmem>>, vector<8x128xbf16>
    tpu.vector_store %arg4[%c0_6, %c0_7], %8 {strides = array<i32>} : memref<8x128xbf16, #tpu.memory_space<vmem>>, vector<8x128xbf16>,
    return
  }
  func.func @transform_0(%arg0: i32) -> (i32, i32) {
    %c0_i32 = arith.constant 0 : i32
    %c0_i32_0 = arith.constant 0 : i32
    %c0_i32_1 = arith.constant 0 : i32
    return %c0_i32, %c0_i32_0 : i32, i32
  }
  func.func @transform_1(%arg0: i32) -> (i32, i32) {
    %c0_i32 = arith.constant 0 : i32
    %c0_i32_0 = arith.constant 0 : i32
    return %c0_i32, %arg0 : i32, i32
  }
  func.func @transform_2(%arg0: i32) -> (i32, i32) {
    %c0_i32 = arith.constant 0 : i32
    %c0_i32_0 = arith.constant 0 : i32
    %c0_i32_1 = arith.constant 0 : i32
    return %c0_i32, %c0_i32_0 : i32, i32
  }
  func.func @transform_3(%arg0: i32) -> (i32, i32) {
    %c0_i32 = arith.constant 0 : i32
    %c0_i32_0 = arith.constant 0 : i32
    return %c0_i32, %arg0 : i32, i32
  }
}

module attributes {stable_mosaic.version = 11 : i64} {
  func.func @kernel(%arg0: i32, %arg1: memref<64x64xbf16, #tpu.memory_space<vmem>>, %arg2: memref<64x128xbf16, #tpu.memory_space<vmem>>, %arg3: memref<64x1xf32, #tpu.memory_space<vmem>>, %arg4: memref<64x128xbf16, #tpu.memory_space<vmem>>, %arg5: memref<64x128xbf16, #tpu.memory_space<vmem>>) attributes {dimension_semantics = [#tpu.dimension_semantics<parallel>], iteration_bounds = array<i64: 1>, scalar_prefetch = 0 : i64, scratch_operands = 0 : i64, tpu.core_type = #tpu.core_type<tc>, window_params = [{pipeline_mode = #tpu.pipeline_mode<synchronous>, transform_indices = @transform_0, window_bounds = array<i64: 64, 64>}, {transform_indices = @transform_1, window_bounds = array<i64: 64, 128>}, {pipeline_mode = #tpu.pipeline_mode<synchronous>, transform_indices = @transform_2, window_bounds = array<i64: 64, 1>}, {transform_indices = @transform_3, window_bounds = array<i64: 64, 128>}, {transform_indices = @transform_4, window_bounds = array<i64: 64, 128>}]} {
    %c0 = arith.constant 0 : index
    %c0_0 = arith.constant 0 : index
    %0 = vector.load %arg1[%c0, %c0_0] : memref<64x64xbf16, #tpu.memory_space<vmem>>, vector<64x64xbf16>
    %c0_1 = arith.constant 0 : index
    %c0_2 = arith.constant 0 : index
    %1 = vector.load %arg2[%c0_1, %c0_2] : memref<64x128xbf16, #tpu.memory_space<vmem>>, vector<64x128xbf16>
    %cst = arith.constant dense<0.000000e+00> : vector<64x128xf32>
    %2 = tpu.matmul %0, %1, %cst {dimension_numbers = #tpu.dot_dimension_numbers<[1], [0], [0], [1], [0, 0, 1, 1], [], []>} : vector<64x64xbf16>, vector<64x128xbf16>, vector<64x128xf32> -> vector<64x128xf32>
    %c0_3 = arith.constant 0 : index
    %c0_4 = arith.constant 0 : index
    %3 = vector.load %arg3[%c0_3, %c0_4] : memref<64x1xf32, #tpu.memory_space<vmem>>, vector<64x1xf32>
    %4 = vector.broadcast %3 : vector<64x1xf32> to vector<64x128xf32>
    %5 = arith.addf %2, %4 : vector<64x128xf32>
    %c0_5 = arith.constant 0 : index
    %c0_6 = arith.constant 0 : index
    %6 = vector.load %arg4[%c0_5, %c0_6] : memref<64x128xbf16, #tpu.memory_space<vmem>>, vector<64x128xbf16>
    %7 = arith.extf %6 : vector<64x128xbf16> to vector<64x128xf32>
    %8 = arith.addf %5, %7 : vector<64x128xf32>
    %cst_7 = arith.constant 0.000000e+00 : f32
    %9 = vector.broadcast %cst_7 : f32 to vector<64x128xf32>
    %10 = arith.maximumf %8, %9 : vector<64x128xf32>
    %11 = arith.truncf %10 : vector<64x128xf32> to vector<64x128xbf16>
    %c0_8 = arith.constant 0 : index
    %c0_9 = arith.constant 0 : index
    %12 = vector.load %arg5[%c0_8, %c0_9] : memref<64x128xbf16, #tpu.memory_space<vmem>>, vector<64x128xbf16>
    tpu.vector_store %arg5[%c0_8, %c0_9], %11 {strides = array<i32>} : memref<64x128xbf16, #tpu.memory_space<vmem>>, vector<64x128xbf16>,
    return
  }
  func.func @transform_0(%arg0: i32) -> (i32, i32) {
    %c0_i32 = arith.constant 0 : i32
    %c0_i32_0 = arith.constant 0 : i32
    %c0_i32_1 = arith.constant 0 : i32
    return %c0_i32, %c0_i32_0 : i32, i32
  }
  func.func @transform_1(%arg0: i32) -> (i32, i32) {
    %c0_i32 = arith.constant 0 : i32
    %c0_i32_0 = arith.constant 0 : i32
    return %c0_i32, %arg0 : i32, i32
  }
  func.func @transform_2(%arg0: i32) -> (i32, i32) {
    %c0_i32 = arith.constant 0 : i32
    %c0_i32_0 = arith.constant 0 : i32
    %c0_i32_1 = arith.constant 0 : i32
    return %c0_i32, %c0_i32_0 : i32, i32
  }
  func.func @transform_3(%arg0: i32) -> (i32, i32) {
    %c0_i32 = arith.constant 0 : i32
    %c0_i32_0 = arith.constant 0 : i32
    return %c0_i32, %arg0 : i32, i32
  }
  func.func @transform_4(%arg0: i32) -> (i32, i32) {
    %c0_i32 = arith.constant 0 : i32
    %c0_i32_0 = arith.constant 0 : i32
    return %c0_i32, %arg0 : i32, i32
  }
}

module attributes {stable_mosaic.version = 11 : i64} {
  func.func @kernel(%arg0: i32, %arg1: memref<32x64xbf16, #tpu.memory_space<vmem>>, %arg2: memref<64x256xbf16, #tpu.memory_space<vmem>>, %arg3: memref<32x1xf32, #tpu.memory_space<vmem>>, %arg4: memref<32x256xbf16, #tpu.memory_space<vmem>>) attributes {dimension_semantics = [#tpu.dimension_semantics<parallel>], iteration_bounds = array<i64: 1>, scalar_prefetch = 0 : i64, scratch_operands = 0 : i64, tpu.core_type = #tpu.core_type<tc>, window_params = [{pipeline_mode = #tpu.pipeline_mode<synchronous>, transform_indices = @transform_0, window_bounds = array<i64: 32, 64>}, {transform_indices = @transform_1, window_bounds = array<i64: 64, 256>}, {pipeline_mode = #tpu.pipeline_mode<synchronous>, transform_indices = @transform_2, window_bounds = array<i64: 32, 1>}, {transform_indices = @transform_3, window_bounds = array<i64: 32, 256>}]} {
    %c0 = arith.constant 0 : index
    %c0_0 = arith.constant 0 : index
    %0 = vector.load %arg1[%c0, %c0_0] : memref<32x64xbf16, #tpu.memory_space<vmem>>, vector<32x64xbf16>
    %c0_1 = arith.constant 0 : index
    %c0_2 = arith.constant 0 : index
    %1 = vector.load %arg2[%c0_1, %c0_2] : memref<64x256xbf16, #tpu.memory_space<vmem>>, vector<64x256xbf16>
    %cst = arith.constant dense<0.000000e+00> : vector<32x256xf32>
    %2 = tpu.matmul %0, %1, %cst {dimension_numbers = #tpu.dot_dimension_numbers<[1], [0], [0], [1], [0, 0, 1, 1], [], []>} : vector<32x64xbf16>, vector<64x256xbf16>, vector<32x256xf32> -> vector<32x256xf32>
    %c0_3 = arith.constant 0 : index
    %c0_4 = arith.constant 0 : index
    %3 = vector.load %arg3[%c0_3, %c0_4] : memref<32x1xf32, #tpu.memory_space<vmem>>, vector<32x1xf32>
    %4 = vector.broadcast %3 : vector<32x1xf32> to vector<32x256xf32>
    %5 = arith.addf %2, %4 : vector<32x256xf32>
    %6 = arith.truncf %5 : vector<32x256xf32> to vector<32x256xbf16>
    %c0_5 = arith.constant 0 : index
    %c0_6 = arith.constant 0 : index
    %7 = vector.load %arg4[%c0_5, %c0_6] : memref<32x256xbf16, #tpu.memory_space<vmem>>, vector<32x256xbf16>
    tpu.vector_store %arg4[%c0_5, %c0_6], %6 {strides = array<i32>} : memref<32x256xbf16, #tpu.memory_space<vmem>>, vector<32x256xbf16>,
    return
  }
  func.func @transform_0(%arg0: i32) -> (i32, i32) {
    %c0_i32 = arith.constant 0 : i32
    %c0_i32_0 = arith.constant 0 : i32
    %c0_i32_1 = arith.constant 0 : i32
    return %c0_i32, %c0_i32_0 : i32, i32
  }
  func.func @transform_1(%arg0: i32) -> (i32, i32) {
    %c0_i32 = arith.constant 0 : i32
    %c0_i32_0 = arith.constant 0 : i32
    return %c0_i32, %arg0 : i32, i32
  }
  func.func @transform_2(%arg0: i32) -> (i32, i32) {
    %c0_i32 = arith.constant 0 : i32
    %c0_i32_0 = arith.constant 0 : i32
    %c0_i32_1 = arith.constant 0 : i32
    return %c0_i32, %c0_i32_0 : i32, i32
  }
  func.func @transform_3(%arg0: i32) -> (i32, i32) {
    %c0_i32 = arith.constant 0 : i32
    %c0_i32_0 = arith.constant 0 : i32
    return %c0_i32, %arg0 : i32, i32
  }
}

</mosaic_0001>

<bundles_post_ra>
// kernel: hourglass_forward.6
= control target key start
LH: loop header
LB: loop body
LE: loop exit
PB: predicated region body
PF: predicated region fallthrough
CT: control target
= control target key end

     0   :  { %vm108_vm0 = vcmask 1045504   ;;  %v212_v1 = vmov 0   ;;  %vm104_vm1 = vcmask 883712   ;;  %s284_s1 = inlined_call_operand.vmem [shape: bf16[108,256], index: 1, kind: input, shape index: {}]   ;;  %s285_s2 = inlined_call_operand.vmem [shape: f32[8,1], index: 2, kind: input, shape index: {}]   ;;  %s286_s0 = inlined_call_operand.vmem [shape: bf16[8,108], index: 0, kind: input, shape index: {}]   ;;  %s287_s3 = inlined_call_operand.vmem [shape: bf16[8,256], index: 3, kind: output, shape index: {}]  }
   0x1   :  { %v191_v0 = vld [vmem:[%s284_s1 + $0x64] ss:$8 sps:$4 sm:$0x3f]   ;;  %147 = vmatprep.mubr.bf16.mxu0 %v212_v1  ;;  %190 = vset.pattern.permute.xlu0 %v212_v1  ;;  %v193_v2 = vld [vmem:[%s284_s1 + $0x60] ss:$8 sps:$4 sm:$0x3f]  }
   0x2   :  { %185 = vmatprep.subr.msk.bf16.mxu0 %vm108_vm0, %v191_v0  ;;  %v194_v3 = vld [vmem:[%s284_s1 + $0x54] ss:$8 sps:$4 sm:$0xff]   ;;  %v110_v4 = vsel %vm108_vm0, %v193_v2, 0  ;;  %v196_v5 = vld [vmem:[%s284_s1 + $0x50] ss:$8 sps:$4 sm:$0xff]   ;;  %v30_v9 = vld [vmem:[%s285_s2] sm:$0xff] }
   0x3   :  { %118 = vmatpush1.bf16.msra.mxu0 %v110_v4  ;;  %v197_v6 = vld [vmem:[%s284_s1 + $0x44] ss:$8 sps:$4 sm:$0xff]   ;;  %v199_v7 = vld [vmem:[%s284_s1 + $0x40] ss:$8 sps:$4 sm:$0xff]   ;;  %v200_v8 = vld [vmem:[%s284_s1 + $0x34] ss:$8 sps:$4 sm:$0xff]   ;;  %33 = vperm.xlu0 %190, %v30_v9  }
   0x4   :  { %119 = vmatprep.subr.bf16.mxu0 %v194_v3  ;;  %v202_v10 = vld [vmem:[%s284_s1 + $0x30] ss:$8 sps:$4 sm:$0xff]   ;;  %v203_v11 = vld [vmem:[%s284_s1 + $0x24] ss:$8 sps:$4 sm:$0xff]   ;;  %v205_v12 = vld [vmem:[%s284_s1 + $0x20] ss:$8 sps:$4 sm:$0xff]  }
   0x5   :  { %v206_v13 = vld [vmem:[%s284_s1 + $0x14] ss:$8 sps:$4 sm:$0xff]   ;;  %v208_v14 = vld [vmem:[%s284_s1 + $0x10] ss:$8 sps:$4 sm:$0xff]   ;;  %v209_v15 = vld [vmem:[%s284_s1 + $0x4] ss:$8 sps:$4 sm:$0xff]  }
   0x6   :  { %v211_v16 = vld [vmem:[%s284_s1] ss:$8 sps:$4 sm:$0xff]  }
   0x7   :  { %120 = vmatpush1.bf16.msra.mxu0 %v196_v5  ;;  %v15_v17 = vld [vmem:[%s286_s0] sm:$0xf] }
   0x8   :  { %121 = vmatprep.subr.bf16.mxu0 %v197_v6 }
   0xb   :  { %122 = vmatpush1.bf16.msra.mxu0 %v199_v7 }
   0xc   :  { %123 = vmatprep.subr.bf16.mxu0 %v200_v8 }
   0xf   :  { %124 = vmatpush1.bf16.msra.mxu0 %v202_v10 }
  0x10   :  { %125 = vmatprep.subr.bf16.mxu0 %v203_v11 }
  0x13   :  { %126 = vmatpush1.bf16.msra.mxu0 %v205_v12 }
  0x14   :  { %127 = vmatprep.subr.bf16.mxu0 %v206_v13 }
  0x17   :  { %128 = vmatpush1.bf16.msra.mxu0 %v208_v14 }
  0x18   :  { %129 = vmatprep.subr.bf16.mxu0 %v209_v15 }
  0x1b   :  { %130 = vmatpush1.bf16.msra.mxu0 %v211_v16 }
  0x1e   :  { %186 = vmatmul.mubr.msk.bf16.vlgmr.msra.gmra.mxu0 %vm104_vm1, %v15_v17 }
  0x7e   :  { %v34_v18 = vpop.permute.xlu0 %33 }
  0xde   :  { %v149_v19 = vpop.f32.mrf.mxu0 }
  0xdf   :  { %v150_v20 = vadd.f32 %v149_v19, %v34_v18 }
  0xe0   :  { %v151_v21 = vpop.f32.mrf.mxu0 }
  0xe1   :  { %v152_v22 = vadd.f32 %v151_v21, %v34_v18  ;;  %v156_v24 = vmax.f32 %v150_v20, 0.0 }
  0xe2   :  { %v153_v23 = vpop.f32.mrf.mxu0 }
  0xe3   :  { %v157_v25 = vmax.f32 %v152_v22, 0.0 }
  0xe4   :  { %v154_v26 = vpop.f32.mrf.mxu0 }
  0xe5   :  { %v188_v27 = vpack.c.bf16 %v157_v25, %v156_v24 }
  0xe7   :  { %166 = vst [vmem:[%s287_s3] sm:$0xff] %v188_v27 }

// kernel: hourglass_forward.7
= control target key start
LH: loop header
LB: loop body
LE: loop exit
PB: predicated region body
PF: predicated region fallthrough
CT: control target
= control target key end

     0   :  { %v336_v1 = vmov 0   ;;  %vm190_vm0 = vcmask 719872   ;;  %vm194_vm1 = vcmask 1043456   ;;  %s447_s1 = inlined_call_operand.vmem [shape: bf16[216,256], index: 1, kind: input, shape index: {}]   ;;  %s448_s0 = inlined_call_operand.vmem [shape: bf16[8,216], index: 0, kind: input, shape index: {}]   ;;  %s449_s2 = inlined_call_operand.vmem [shape: f32[8,1], index: 2, kind: input, shape index: {}]   ;;  %s450_s3 = inlined_call_operand.vmem [shape: bf16[8,256], index: 3, kind: output, shape index: {}]  }
   0x1   :  { %v293_v0 = vld [vmem:[%s447_s1 + $0x74] ss:$8 sps:$4 sm:$0xff]   ;;  %292 = vset.pattern.permute.xlu0 %v336_v1  ;;  %v295_v2 = vld [vmem:[%s447_s1 + $0x70] ss:$8 sps:$4 sm:$0xff]   ;;  %v296_v3 = vld [vmem:[%s447_s1 + $0x64] ss:$8 sps:$4 sm:$0xff]  }
   0x2   :  { %201 = vmatprep.subr.bf16.mxu0 %v293_v0  ;;  %v298_v4 = vld [vmem:[%s447_s1 + $0x60] ss:$8 sps:$4 sm:$0xff]   ;;  %v299_v5 = vld [vmem:[%s447_s1 + $0x54] ss:$8 sps:$4 sm:$0xff]   ;;  %v301_v6 = vld [vmem:[%s447_s1 + $0x50] ss:$8 sps:$4 sm:$0xff]  }
   0x3   :  { %202 = vmatpush1.bf16.msra.mxu0 %v295_v2  ;;  %v302_v7 = vld [vmem:[%s447_s1 + $0x44] ss:$8 sps:$4 sm:$0xff]   ;;  %v304_v8 = vld [vmem:[%s447_s1 + $0x40] ss:$8 sps:$4 sm:$0xff]   ;;  %v305_v9 = vld [vmem:[%s447_s1 + $0x34] ss:$8 sps:$4 sm:$0xff]  }
   0x4   :  { %203 = vmatprep.subr.bf16.mxu0 %v296_v3  ;;  %v307_v10 = vld [vmem:[%s447_s1 + $0x30] ss:$8 sps:$4 sm:$0xff]   ;;  %v308_v11 = vld [vmem:[%s447_s1 + $0x24] ss:$8 sps:$4 sm:$0xff]   ;;  %v310_v15 = vld [vmem:[%s447_s1 + $0x20] ss:$8 sps:$4 sm:$0xff]  }
   0x5   :  { %v15_v12 = vld [vmem:[%s448_s0] sm:$0xff]  ;;  %v311_v16 = vld [vmem:[%s447_s1 + $0x14] ss:$8 sps:$4 sm:$0xff]   ;;  %v313_v17 = vld [vmem:[%s447_s1 + $0x10] ss:$8 sps:$4 sm:$0xff]  }
   0x6   :  { %v258_v13 = vcombine.high %v15_v12, %v15_v12  ;;  %v43_v14 = vld [vmem:[%s449_s2] sm:$0xff]  ;;  %v42_v19 = vld [vmem:[%s447_s1 + $0xd0] sm:$0xff]  ;;  %v257_v34 = vcombine.low %v15_v12, %v15_v12 }
   0x7   :  { %204 = vmatpush1.bf16.msra.mxu0 %v298_v4  ;;  %46 = vperm.xlu0 %292, %v43_v14   ;;  %v314_v18 = vld [vmem:[%s447_s1 + $0x4] ss:$8 sps:$4 sm:$0xff]   ;;  %v316_v20 = vld [vmem:[%s447_s1] ss:$8 sps:$4 sm:$0xff]   ;;  %v286_v21 = vcombine.high %v42_v19, %v42_v19  ;;  %v285_v22 = vcombine.low %v42_v19, %v42_v19  ;;  %v322_v26 = vld [vmem:[%s447_s1 + $0xb4] ss:$8 sps:$4 sm:$0xff]  }
   0x8   :  { %205 = vmatprep.subr.bf16.mxu0 %v299_v5  ;;  %288 = vmatprep.mubr.msk.bf16.mxu0 %vm190_vm0, %v258_v13  ;;  %v319_v24 = vld [vmem:[%s447_s1 + $0xc4] ss:$8 sps:$4 sm:$0xff]   ;;  %v321_v25 = vld [vmem:[%s447_s1 + $0xc0] ss:$8 sps:$4 sm:$0xff]   ;;  %v324_v27 = vld [vmem:[%s447_s1 + $0xb0] ss:$8 sps:$4 sm:$0xff]  }
   0x9   :  { %v196_v23 = vsel %vm194_vm1, %v285_v22, 0  ;;  %v325_v28 = vld [vmem:[%s447_s1 + $0xa4] ss:$8 sps:$4 sm:$0xff]   ;;  %v327_v29 = vld [vmem:[%s447_s1 + $0xa0] ss:$8 sps:$4 sm:$0xff]  }
   0xa   :  { %v328_v30 = vld [vmem:[%s447_s1 + $0x94] ss:$8 sps:$4 sm:$0xff]   ;;  %v330_v31 = vld [vmem:[%s447_s1 + $0x90] ss:$8 sps:$4 sm:$0xff]   ;;  %v331_v32 = vld [vmem:[%s447_s1 + $0x84] ss:$8 sps:$4 sm:$0xff]  }
   0xb   :  { %206 = vmatpush1.bf16.msra.mxu0 %v301_v6  ;;  %v333_v33 = vld [vmem:[%s447_s1 + $0x80] ss:$8 sps:$4 sm:$0xff]  }
   0xc   :  { %207 = vmatprep.subr.bf16.mxu0 %v302_v7 }
   0xf   :  { %208 = vmatpush1.bf16.msra.mxu0 %v304_v8 }
  0x10   :  { %209 = vmatprep.subr.bf16.mxu0 %v305_v9 }
  0x13   :  { %210 = vmatpush1.bf16.msra.mxu0 %v307_v10 }
  0x14   :  { %211 = vmatprep.subr.bf16.mxu0 %v308_v11 }
  0x17   :  { %212 = vmatpush1.bf16.msra.mxu0 %v310_v15 }
  0x18   :  { %213 = vmatprep.subr.bf16.mxu0 %v311_v16 }
  0x1b   :  { %214 = vmatpush1.bf16.msra.mxu0 %v313_v17 }
  0x1c   :  { %215 = vmatprep.subr.bf16.mxu0 %v314_v18 }
  0x1f   :  { %216 = vmatpush1.bf16.msra.mxu0 %v316_v20 }
  0x20   :  { %287 = vmatprep.subr.msk.bf16.mxu0 %vm194_vm1, %v286_v21 }
  0x23   :  { %222 = vmatpush2.bf16.msra.mxu0 %v196_v23 }
  0x24   :  { %223 = vmatprep.subr.bf16.mxu0 %v319_v24 }
  0x27   :  { %224 = vmatpush2.bf16.msra.mxu0 %v321_v25 }
  0x28   :  { %225 = vmatprep.subr.bf16.mxu0 %v322_v26 }
  0x2b   :  { %226 = vmatpush2.bf16.msra.mxu0 %v324_v27 }
  0x2c   :  { %227 = vmatprep.subr.bf16.mxu0 %v325_v28 }
  0x2f   :  { %228 = vmatpush2.bf16.msra.mxu0 %v327_v29 }
  0x30   :  { %229 = vmatprep.subr.bf16.mxu0 %v328_v30 }
  0x33   :  { %230 = vmatpush2.bf16.msra.mxu0 %v330_v31 }
  0x34   :  { %231 = vmatprep.subr.bf16.mxu0 %v331_v32 }
  0x37   :  { %232 = vmatpush2.bf16.msra.mxu0 %v333_v33 }
  0x3a   :  { %234 = vmatmul.mubr.bf16.vlgmr.msra.gmra.mxu0 %v257_v34 }
  0x82   :  { %v47_v35 = vpop.permute.xlu0 %46 }
  0xfa   :  { %v235_v36 = vpop.f32.mrf.mxu0 }
  0xfb   :  { %v236_v37 = vadd.f32 %v235_v36, %v47_v35 }
  0xfc   :  { %v237_v38 = vpop.f32.mrf.mxu0 }
  0xfd   :  { %v238_v39 = vadd.f32 %v237_v38, %v47_v35  ;;  %v242_v41 = vmax.f32 %v236_v37, 0.0 }
  0xfe   :  { %v239_v40 = vpop.f32.mrf.mxu0 }
  0xff   :  { %v243_v42 = vmax.f32 %v238_v39, 0.0 }
 0x100   :  { %v240_v43 = vpop.f32.mrf.mxu0 }
 0x101   :  { %v290_v44 = vpack.c.bf16 %v243_v42, %v242_v41 }
 0x103   :  { %252 = vst [vmem:[%s450_s3] sm:$0xff] %v290_v44 }

// kernel: hourglass_forward.8
= control target key start
LH: loop header
LB: loop body
LE: loop exit
PB: predicated region body
PF: predicated region fallthrough
CT: control target
= control target key end

     0   :  { %v226_v0 = vmov 0   ;;  %vm136_vm0 = vcmask 719872   ;;  %vm140_vm1 = vcmask 1043456   ;;  %s298_s1 = inlined_call_operand.vmem [shape: bf16[216,128], index: 1, kind: input, shape index: {}]   ;;  %s299_s0 = inlined_call_operand.vmem [shape: bf16[8,216], index: 0, kind: input, shape index: {}]   ;;  %s300_s2 = inlined_call_operand.vmem [shape: f32[8,1], index: 2, kind: input, shape index: {}]   ;;  %s301_s3 = inlined_call_operand.vmem [shape: bf16[8,128], index: 3, kind: output, shape index: {}]  }
   0x1   :  { %144 = vmatprep.subr.bf16.mxu0 %v226_v0  ;;  %v210_v1 = vld [vmem:[%s298_s1 + $0x38] sm:$0xff]   ;;  %209 = vset.pattern.permute.xlu0 %v226_v0  ;;  %v211_v2 = vld [vmem:[%s298_s1 + $0x30] sm:$0xff]   ;;  %v212_v3 = vld [vmem:[%s298_s1 + $0x28] sm:$0xff]  }
   0x2   :  { %145 = vmatpush1.bf16.msra.mxu0 %v210_v1  ;;  %v213_v4 = vld [vmem:[%s298_s1 + $0x20] sm:$0xff]   ;;  %v214_v6 = vld [vmem:[%s298_s1 + $0x18] sm:$0xff]   ;;  %v215_v9 = vld [vmem:[%s298_s1 + $0x10] sm:$0xff]  }
   0x3   :  { %146 = vmatprep.subr.bf16.mxu0 %v226_v0  ;;  %v15_v5 = vld [vmem:[%s299_s0] sm:$0xff]  ;;  %v216_v10 = vld [vmem:[%s298_s1 + $0x8] sm:$0xff]   ;;  %v220_v15 = vld [vmem:[%s298_s1 + $0x58] sm:$0xff]  }
   0x4   :  { %v192_v7 = vcombine.high %v15_v5, %v15_v5  ;;  %v43_v8 = vld [vmem:[%s300_s2] sm:$0xff]  ;;  %v218_v12 = vld [vmem:[%s298_s1 + $0x68] ss:$0 sps:$4 sm:$0xff]   ;;  %v221_v16 = vld [vmem:[%s298_s1 + $0x50] sm:$0xff]   ;;  %v191_v19 = vcombine.low %v15_v5, %v15_v5 }
   0x5   :  { %46 = vperm.xlu0 %209, %v43_v8   ;;  %v217_v11 = vld [vmem:[%s298_s1] sm:$0xff]   ;;  %v142_v13 = vsel %vm140_vm1, %v218_v12, 0  ;;  %v222_v17 = vld [vmem:[%s298_s1 + $0x48] sm:$0xff]  }
   0x6   :  { %147 = vmatpush1.bf16.msra.mxu0 %v211_v2  ;;  %207 = vmatprep.mubr.msk.bf16.mxu0 %vm136_vm0, %v192_v7  ;;  %v219_v14 = vld [vmem:[%s298_s1 + $0x60] sm:$0xff]  }
   0x7   :  { %148 = vmatprep.subr.bf16.mxu0 %v226_v0  ;;  %v223_v18 = vld [vmem:[%s298_s1 + $0x40] sm:$0xff]  }
   0xa   :  { %149 = vmatpush1.bf16.msra.mxu0 %v212_v3 }
   0xb   :  { %150 = vmatprep.subr.bf16.mxu0 %v226_v0 }
   0xe   :  { %151 = vmatpush1.bf16.msra.mxu0 %v213_v4 }
   0xf   :  { %152 = vmatprep.subr.bf16.mxu0 %v226_v0 }
  0x12   :  { %153 = vmatpush1.bf16.msra.mxu0 %v214_v6 }
  0x13   :  { %154 = vmatprep.subr.bf16.mxu0 %v226_v0 }
  0x16   :  { %155 = vmatpush1.bf16.msra.mxu0 %v215_v9 }
  0x17   :  { %156 = vmatprep.subr.bf16.mxu0 %v226_v0 }
  0x1a   :  { %157 = vmatpush1.bf16.msra.mxu0 %v216_v10 }
  0x1b   :  { %158 = vmatprep.subr.bf16.mxu0 %v226_v0 }
  0x1e   :  { %159 = vmatpush1.bf16.msra.mxu0 %v217_v11 }
  0x1f   :  { %164 = vmatprep.subr.bf16.mxu0 %v226_v0 }
  0x22   :  { %165 = vmatpush2.bf16.msra.mxu0 %v142_v13 }
  0x23   :  { %166 = vmatprep.subr.bf16.mxu0 %v226_v0 }
  0x26   :  { %167 = vmatpush2.bf16.msra.mxu0 %v219_v14 }
  0x27   :  { %168 = vmatprep.subr.bf16.mxu0 %v226_v0 }
  0x2a   :  { %169 = vmatpush2.bf16.msra.mxu0 %v220_v15 }
  0x2b   :  { %170 = vmatprep.subr.bf16.mxu0 %v226_v0 }
  0x2e   :  { %171 = vmatpush2.bf16.msra.mxu0 %v221_v16 }
  0x2f   :  { %172 = vmatprep.subr.bf16.mxu0 %v226_v0 }
  0x32   :  { %173 = vmatpush2.bf16.msra.mxu0 %v222_v17 }
  0x33   :  { %174 = vmatprep.subr.bf16.mxu0 %v226_v0 }
  0x36   :  { %175 = vmatpush2.bf16.msra.mxu0 %v223_v18 }
  0x39   :  { %177 = vmatmul.mubr.bf16.vlgmr.msra.gmra.mxu0 %v191_v19 }
  0x80   :  { %v47_v20 = vpop.permute.xlu0 %46 }
  0xf9   :  { %v178_v21 = vpop.f32.mrf.mxu0 }
  0xfa   :  { %v179_v22 = vadd.f32 %v178_v21, %v47_v20 }
  0xfb   :  { %v180_v23 = vpop.f32.mrf.mxu0 }
  0xfc   :  { %v184_v24 = vmax.f32 %v179_v22, 0.0 }
  0xfd   :  { %v181_v25 = vpop.f32.mrf.mxu0 }
  0xfe   :  { %v185_v26 = vpack.c.bf16 %v184_v24, %v184_v24 }
  0xff   :  { %v182_v27 = vpop.f32.mrf.mxu0 }
 0x100   :  { %186 = vst [vmem:[%s301_s3] sm:$0xf] %v185_v26 }

// kernel: hourglass_forward.10
= control target key start
LH: loop header
LB: loop body
LE: loop exit
PB: predicated region body
PF: predicated region fallthrough
CT: control target
= control target key end

     0   :  { %v393_v1 = vmov 0   ;;  %vm126_vm0 = vcmask 523264   ;;  %s495_s1 = inlined_call_operand.vmem [shape: bf16[64,128], index: 1, kind: input, shape index: {}]   ;;  %s496_s0 = inlined_call_operand.vmem [shape: bf16[64,64], index: 0, kind: input, shape index: {}]   ;;  %s497_s2 = inlined_call_operand.vmem [shape: f32[64,1], index: 2, kind: input, shape index: {}]   ;;  %s498_s3 = inlined_call_operand.vmem [shape: bf16[64,128], index: 3, kind: input, shape index: {}]   ;;  %s499_s4 = inlined_call_operand.vmem [shape: bf16[64,128], index: 4, kind: output, shape index: {}]  }
   0x1   :  { %v385_v0 = vld [vmem:[%s495_s1 + $0x18] sm:$0xff]   ;;  %384 = vset.pattern.permute.xlu1 %v393_v1  ;;  %383 = vset.pattern.permute.xlu0 %v393_v1  ;;  %v386_v2 = vld [vmem:[%s495_s1 + $0x10] sm:$0xff]   ;;  %v387_v3 = vld [vmem:[%s495_s1 + $0x8] sm:$0xff]  }
   0x2   :  { %358 = vmatprep.subr.bf16.mxu0 %v385_v0  ;;  %374 = vmatprep.subr.bf16.mxu1 %v385_v0  ;;  %v389_v4 = vld [vmem:[%s496_s0] sm:$0xff]   ;;  %v390_v5 = vld [vmem:[%s496_s0 + $0x10] sm:$0xff]   ;;  %v37_v9 = vld [vmem:[%s497_s2 + $0x18] sm:$0xff] }
   0x3   :  { %359 = vmatpush3.bf16.msra.mxu0 %v385_v0  ;;  %378 = vmatpush3.bf16.msra.mxu1 %v385_v0  ;;  %v388_v6 = vld [vmem:[%s495_s1] sm:$0xff]   ;;  %v36_v7 = vld [vmem:[%s497_s2 + $0x10] sm:$0xff]  ;;  %v35_v10 = vld [vmem:[%s497_s2 + $0x8] sm:$0xff] }
   0x4   :  { %360 = vmatprep.subr.bf16.mxu0 %v386_v2  ;;  %375 = vmatprep.subr.bf16.mxu1 %v386_v2  ;;  %v34_v8 = vld [vmem:[%s497_s2] sm:$0xff]  ;;  %v391_v11 = vld [vmem:[%s496_s0 + $0x8] sm:$0xff]   ;;  %v392_v12 = vld [vmem:[%s496_s0 + $0x18] sm:$0xff]  }
   0x5   :  { %366 = vmatprep.mubr.msk.bf16.mxu0 %vm126_vm0, %v389_v4  ;;  %370 = vmatprep.mubr.msk.bf16.mxu1 %vm126_vm0, %v390_v5  ;;  %v39_v13 = vld [vmem:[%s497_s2 + $0x28] sm:$0xff]  ;;  %v38_v14 = vld [vmem:[%s497_s2 + $0x20] sm:$0xff]  ;;  %v41_v15 = vld [vmem:[%s497_s2 + $0x38] sm:$0xff] }
   0x6   :  { %54 = vperm.xlu1 %384, %v36_v7   ;;  %44 = vperm.xlu0 %383, %v34_v8   ;;  %v40_v16 = vld [vmem:[%s497_s2 + $0x30] sm:$0xff]  ;;  %v344_v23 = vld [vmem:[%s498_s3 + $0x8] sm:$0xff]   ;;  %v346_v24 = vld [vmem:[%s498_s3 + $0x18] sm:$0xff]  }
   0x7   :  { %361 = vmatpush3.bf16.msra.mxu0 %v386_v2  ;;  %379 = vmatpush3.bf16.msra.mxu1 %v386_v2  ;;  %v309_v27 = vld [vmem:[%s498_s3] sm:$0xff]   ;;  %v345_v28 = vld [vmem:[%s498_s3 + $0x10] sm:$0xff]   ;;  %v314_v31 = vunpack.c.l.bf16 %v344_v23  ;;  %v322_v33 = vunpack.c.l.bf16 %v346_v24  ;;  %v315_v41 = vunpack.c.h.bf16 %v344_v23  ;;  %v323_v43 = vunpack.c.h.bf16 %v346_v24 }
   0x8   :  { %362 = vmatprep.subr.bf16.mxu0 %v387_v3  ;;  %376 = vmatprep.subr.bf16.mxu1 %v387_v3  ;;  %v310_v37 = vunpack.c.l.bf16 %v309_v27  ;;  %v318_v39 = vunpack.c.l.bf16 %v345_v28  ;;  %v311_v45 = vunpack.c.h.bf16 %v309_v27  ;;  %v319_v46 = vunpack.c.h.bf16 %v345_v28 }
   0xa   :  { %59 = vperm.xlu1 %384, %v37_v9   ;;  %49 = vperm.xlu0 %383, %v35_v10  }
   0xb   :  { %363 = vmatpush3.bf16.msra.mxu0 %v387_v3  ;;  %380 = vmatpush3.bf16.msra.mxu1 %v387_v3 }
   0xc   :  { %364 = vmatprep.subr.bf16.mxu0 %v388_v6  ;;  %377 = vmatprep.subr.bf16.mxu1 %v388_v6 }
   0xe   :  { %69 = vperm.xlu1 %384, %v39_v13   ;;  %64 = vperm.xlu0 %383, %v38_v14  }
   0xf   :  { %365 = vmatpush3.bf16.msra.mxu0 %v388_v6  ;;  %381 = vmatpush3.bf16.msra.mxu1 %v388_v6 }
  0x12   :  { %367 = vmatmul.mubr.msk.bf16.vlgmr.msra.gmra.mxu0 %vm126_vm0, %v391_v11  ;;  %371 = vmatmul.mubr.msk.bf16.vlgmr.msra.gmra.mxu1 %vm126_vm0, %v392_v12 }
  0x13   :  { %79 = vperm.xlu1 %384, %v41_v15   ;;  %74 = vperm.xlu0 %383, %v40_v16  }
  0x81   :  { %v45_v17 = vpop.permute.xlu0 %44  ;;  %v55_v18 = vpop.permute.xlu1 %54 }
  0x85   :  { %v50_v19 = vpop.permute.xlu0 %49  ;;  %v60_v20 = vpop.permute.xlu1 %59 }
  0x89   :  { %v65_v21 = vpop.permute.xlu0 %64  ;;  %v70_v22 = vpop.permute.xlu1 %69 }
  0x8e   :  { %v75_v29 = vpop.permute.xlu0 %74  ;;  %v80_v44 = vpop.permute.xlu1 %79 }
  0xd2   :  { %v368_v25 = vpop.f32.mrf.mxu0  ;;  %v372_v26 = vpop.f32.mrf.mxu1 }
  0xd3   :  { %v182_v30 = vadd.f32 %v368_v25, %v55_v18  ;;  %v198_v32 = vadd.f32 %v372_v26, %v75_v29 }
  0xd4   :  { %v173_v34 = vpop.f32.mrf.mxu0  ;;  %v189_v35 = vpop.f32.mrf.mxu1 }
  0xd5   :  { %v174_v36 = vadd.f32 %v173_v34, %v45_v17  ;;  %v190_v38 = vadd.f32 %v189_v35, %v65_v21  ;;  %v222_v47 = vadd.f32 %v314_v31, %v182_v30  ;;  %v226_v48 = vadd.f32 %v322_v33, %v198_v32 }
  0xd6   :  { %v369_v40 = vpop.f32.mrf.mxu0  ;;  %v373_v42 = vpop.f32.mrf.mxu1 }
  0xd7   :  { %v185_v49 = vadd.f32 %v369_v40, %v60_v20  ;;  %v201_v50 = vadd.f32 %v373_v42, %v80_v44  ;;  %v220_v53 = vadd.f32 %v310_v37, %v174_v36  ;;  %v224_v54 = vadd.f32 %v318_v39, %v190_v38 }
  0xd8   :  { %v176_v51 = vpop.f32.mrf.mxu0  ;;  %v192_v52 = vpop.f32.mrf.mxu1  ;;  %v230_v61 = vmax.f32 %v222_v47, 0.0  ;;  %v234_v62 = vmax.f32 %v226_v48, 0.0 }
  0xd9   :  { %v177_v55 = vadd.f32 %v176_v51, %v50_v19  ;;  %v193_v56 = vadd.f32 %v192_v52, %v70_v22  ;;  %v223_v57 = vadd.f32 %v315_v41, %v185_v49  ;;  %v227_v58 = vadd.f32 %v323_v43, %v201_v50 }
  0xda   :  { %v228_v1 = vmax.f32 %v220_v53, 0.0  ;;  %v232_v2 = vmax.f32 %v224_v54, 0.0 }
  0xdb   :  { %v221_v59 = vadd.f32 %v311_v45, %v177_v55  ;;  %v225_v60 = vadd.f32 %v319_v46, %v193_v56  ;;  %v231_v63 = vmax.f32 %v223_v57, 0.0  ;;  %v235_v0 = vmax.f32 %v227_v58, 0.0 }
  0xdd   :  { %v229_v3 = vmax.f32 %v221_v59, 0.0  ;;  %v233_v4 = vmax.f32 %v225_v60, 0.0  ;;  %v332_v5 = vpack.c.bf16 %v231_v63, %v230_v61  ;;  %v342_v6 = vpack.c.bf16 %v235_v0, %v234_v62 }
  0xdf   :  { %v327_v7 = vpack.c.bf16 %v229_v3, %v228_v1  ;;  %v337_v8 = vpack.c.bf16 %v233_v4, %v232_v2  ;;  %347 = vst [vmem:[%s499_s4 + $0x8] sm:$0xff] %v332_v5   ;;  %349 = vst [vmem:[%s499_s4 + $0x18] sm:$0xff] %v342_v6  }
  0xe1   :  { %328 = vst [vmem:[%s499_s4] sm:$0xff] %v327_v7   ;;  %348 = vst [vmem:[%s499_s4 + $0x10] sm:$0xff] %v337_v8  }

// kernel: hourglass_forward.11
= control target key start
LH: loop header
LB: loop body
LE: loop exit
PB: predicated region body
PF: predicated region fallthrough
CT: control target
= control target key end

     0   :  { %v238_v1 = vmov 0   ;;  %vm101_vm0 = vcmask 523264   ;;  %s313_s1 = inlined_call_operand.vmem [shape: bf16[64,256], index: 1, kind: input, shape index: {}]   ;;  %s314_s0 = inlined_call_operand.vmem [shape: bf16[32,64], index: 0, kind: input, shape index: {}]   ;;  %s315_s2 = inlined_call_operand.vmem [shape: f32[32,1], index: 2, kind: input, shape index: {}]   ;;  %s316_s3 = inlined_call_operand.vmem [shape: bf16[32,256], index: 3, kind: output, shape index: {}]  }
   0x1   :  { %v224_v0 = vld [vmem:[%s313_s1 + $0x34] ss:$8 sps:$4 sm:$0xff]   ;;  %140 = vmatprep.mubr.bf16.mxu0 %v238_v1  ;;  %150 = vmatprep.mubr.bf16.mxu1 %v238_v1  ;;  %v226_v2 = vld [vmem:[%s313_s1 + $0x30] ss:$8 sps:$4 sm:$0xff]   ;;  %v227_v3 = vld [vmem:[%s313_s1 + $0x24] ss:$8 sps:$4 sm:$0xff]  }
   0x2   :  { %223 = vset.pattern.permute.xlu1 %v238_v1  ;;  %222 = vset.pattern.permute.xlu0 %v238_v1  ;;  %v229_v4 = vld [vmem:[%s313_s1 + $0x20] ss:$8 sps:$4 sm:$0xff]   ;;  %v230_v5 = vld [vmem:[%s313_s1 + $0x14] ss:$8 sps:$4 sm:$0xff]   ;;  %v232_v6 = vld [vmem:[%s313_s1 + $0x10] ss:$8 sps:$4 sm:$0xff]  }
   0x3   :  { %116 = vmatprep.subr.bf16.mxu0 %v224_v0  ;;  %213 = vmatprep.subr.bf16.mxu1 %v224_v0  ;;  %v29_v7 = vld [vmem:[%s315_s2 + $0x10] sm:$0xff]  ;;  %v27_v8 = vld [vmem:[%s315_s2] sm:$0xff]  ;;  %v30_v10 = vld [vmem:[%s315_s2 + $0x18] sm:$0xff] }
   0x4   :  { %117 = vmatpush1.bf16.msra.mxu0 %v226_v2  ;;  %217 = vmatpush1.bf16.msra.mxu1 %v226_v2  ;;  %v233_v9 = vld [vmem:[%s313_s1 + $0x4] ss:$8 sps:$4 sm:$0xff]   ;;  %v235_v12 = vld [vmem:[%s313_s1] ss:$8 sps:$4 sm:$0xff]  }
   0x5   :  { %118 = vmatprep.subr.bf16.mxu0 %v227_v3  ;;  %214 = vmatprep.subr.bf16.mxu1 %v227_v3  ;;  %v28_v11 = vld [vmem:[%s315_s2 + $0x8] sm:$0xff]  ;;  %v236_v13 = vld [vmem:[%s314_s0] sm:$0xff]  }
   0x6   :  { %43 = vperm.xlu1 %223, %v29_v7   ;;  %33 = vperm.xlu0 %222, %v27_v8   ;;  %v237_v14 = vld [vmem:[%s314_s0 + $0x8] sm:$0xff]  }
   0x8   :  { %119 = vmatpush1.bf16.msra.mxu0 %v229_v4  ;;  %218 = vmatpush1.bf16.msra.mxu1 %v229_v4 }
   0x9   :  { %120 = vmatprep.subr.bf16.mxu0 %v230_v5  ;;  %215 = vmatprep.subr.bf16.mxu1 %v230_v5 }
   0xa   :  { %48 = vperm.xlu1 %223, %v30_v10   ;;  %38 = vperm.xlu0 %222, %v28_v11  }
   0xc   :  { %121 = vmatpush1.bf16.msra.mxu0 %v232_v6  ;;  %219 = vmatpush1.bf16.msra.mxu1 %v232_v6 }
   0xd   :  { %122 = vmatprep.subr.bf16.mxu0 %v233_v9  ;;  %216 = vmatprep.subr.bf16.mxu1 %v233_v9 }
  0x10   :  { %123 = vmatpush1.bf16.msra.mxu0 %v235_v12  ;;  %220 = vmatpush1.bf16.msra.mxu1 %v235_v12 }
  0x13   :  { %203 = vmatmul.mubr.msk.bf16.vlgmr.msra.gmra.mxu0 %vm101_vm0, %v236_v13  ;;  %204 = vmatmul.mubr.msk.bf16.vlgmr.msra.gmra.mxu1 %vm101_vm0, %v237_v14 }
  0x81   :  { %v44_v15 = vpop.permute.xlu1 %43  ;;  %v34_v16 = vpop.permute.xlu0 %33 }
  0x85   :  { %v49_v27 = vpop.permute.xlu1 %48  ;;  %v39_v28 = vpop.permute.xlu0 %38 }
  0xd3   :  { %v142_v17 = vpop.f32.mrf.mxu0  ;;  %v152_v18 = vpop.f32.mrf.mxu1 }
  0xd4   :  { %v143_v21 = vadd.f32 %v142_v17, %v34_v16  ;;  %v153_v22 = vadd.f32 %v152_v18, %v44_v15 }
  0xd5   :  { %v144_v19 = vpop.f32.mrf.mxu0  ;;  %v154_v20 = vpop.f32.mrf.mxu1 }
  0xd6   :  { %v145_v23 = vadd.f32 %v144_v19, %v34_v16  ;;  %v155_v24 = vadd.f32 %v154_v20, %v44_v15 }
  0xd7   :  { %v146_v25 = vpop.f32.mrf.mxu0  ;;  %v156_v26 = vpop.f32.mrf.mxu1 }
  0xd8   :  { %v209_v29 = vpack.c.bf16 %v145_v23, %v143_v21  ;;  %v211_v30 = vpack.c.bf16 %v155_v24, %v153_v22  ;;  %v147_v33 = vadd.f32 %v146_v25, %v39_v28  ;;  %v157_v34 = vadd.f32 %v156_v26, %v49_v27 }
  0xd9   :  { %v148_v31 = vpop.f32.mrf.mxu0  ;;  %v158_v32 = vpop.f32.mrf.mxu1 }
  0xda   :  { %185 = vst [vmem:[%s316_s3] sm:$0xff] %v209_v29  ;;  %187 = vst [vmem:[%s316_s3 + $0x10] sm:$0xff] %v211_v30  ;;  %v149_v35 = vadd.f32 %v148_v31, %v39_v28  ;;  %v159_v36 = vadd.f32 %v158_v32, %v49_v27 }
  0xdc   :  { %v210_v37 = vpack.c.bf16 %v149_v35, %v147_v33  ;;  %v212_v38 = vpack.c.bf16 %v159_v36, %v157_v34 }
  0xde   :  { %186 = vst [vmem:[%s316_s3 + $0x8] sm:$0xff] %v210_v37  ;;  %188 = vst [vmem:[%s316_s3 + $0x18] sm:$0xff] %v212_v38 }

</bundles_post_ra>
